<compile_context>
chip_gen: v5e
topology: v5e:2x2
jax: 0.10.0
libtpu: 0.0.40
codegen_flags: <defaults>
</compile_context>

<pallas_src>
import jax
import jax.numpy as jnp
from jax.experimental import pallas as pl
from jax.experimental.pallas import tpu as pltpu

BN_EPS = 1e-5
LANE = 128
SUBLANE = 8

# Measured fraction of the HBM roofline reached by the BlockSpec pipeline at a
# given tile width (f32 streaming, v6e) -- used to derate small-tile configs.
_TILE_EFF = {128: 0.29, 256: 0.63, 512: 0.85, 1024: 0.86}


def _round_up(n, m):
    return ((n + m - 1) // m) * m


def _vmem_capacity_bytes():
    cap = 64 << 20  # conservative default = v7x per-core VMEM
    try:
        cap = int(pltpu.get_tpu_info().vmem_capacity_bytes)
    except Exception:
        pass
    return cap


def _plan_tiles(B, Fp, D, C, budget_bytes):
    """Pick (tile_d, tile_c, Dp, Cp, footprint).

    Padding D/C up to the chosen tile is exact (zero weights, gamma=beta=0 give
    hn=0), so tiles are chosen purely on cost: padded weight bytes (the dominant
    HBM traffic at small batch) derated by the measured small-tile pipeline
    efficiency, subject to the double-buffered working set fitting VMEM.
    """
    Dp_min = _round_up(max(D, 1), LANE)
    Cp_min = _round_up(max(C, 1), LANE)

    def footprint(td, tc, n_c):
        bf16, f32, dbl = 2, 4, 2
        return (dbl * B * Fp * bf16                 # x block
                + dbl * Fp * td * bf16              # w1 tile
                + dbl * 3 * SUBLANE * td * f32      # b1 / gamma / beta tiles
                + dbl * td * tc * bf16              # w2 tile
                + dbl * SUBLANE * tc * f32          # b2 tile
                + dbl * B * tc * f32                # output block
                + B * td * f32                      # hn cache scratch
                + n_c * B * tc * f32                # accumulator scratch
                + 8 * B * td * f32)                 # f32 temporaries headroom

    d_cands = [t for t in (1024, 512, 256, 128) if t <= Dp_min or t == LANE]
    c_cands = [t for t in (1024, 512, 256, 128) if t <= Cp_min or t == LANE]

    best = None
    for td in d_cands:
        for tc in c_cands:
            Dp = _round_up(Dp_min, td)
            Cp = _round_up(Cp_min, tc)
            n_c = Cp // tc
            need = footprint(td, tc, n_c)
            if need > budget_bytes:
                continue
            cost = 2.0 * (Fp * Dp + Dp * Cp) / _TILE_EFF[td]
            key = (cost, -td, -tc)
            if best is None or key < best[0]:
                best = (key, td, tc, Dp, Cp, need)
    if best is None:  # fall back to minimum tiles even if the estimate exceeds budget
        td = tc = LANE
        Dp, Cp = _round_up(Dp_min, td), _round_up(Cp_min, tc)
        return td, tc, Dp, Cp, footprint(td, tc, Cp // tc)
    _, td, tc, Dp, Cp, need = best
    return td, tc, Dp, Cp, need


def _inter_fc_kernel(x_ref, w1_ref, b1_ref, gamma_ref, beta_ref,
                     w2_ref, b2_ref, out_ref, hn_ref, acc_ref):
    d = pl.program_id(0)              # hidden-dim tile (reduction for matmul #2)
    c = pl.program_id(1)              # class-dim tile
    n_d = pl.num_programs(0)

    @pl.when(c == 0)
    def _():
        # Linear #1 (completer contribution pre-folded into b1) + ReLU +
        # BatchNorm1d with batch statistics.  All per-feature, so a D tile is
        # exact; cached in VMEM and reused for every C tile of this D tile.
        h = jnp.dot(x_ref[...], w1_ref[...], preferred_element_type=jnp.float32)
        h = jnp.maximum(h + b1_ref[...], 0.0)
        inv_b = 1.0 / h.shape[0]
        s1 = jnp.sum(h, axis=0, keepdims=True)
        s2 = jnp.sum(h * h, axis=0, keepdims=True)
        mean = s1 * inv_b
        var = jnp.maximum(s2 * inv_b - mean * mean, 0.0)   # guard cancellation
        scale = gamma_ref[...] * jax.lax.rsqrt(var + BN_EPS)
        shift = beta_ref[...] - mean * scale
        hn_ref[...] = h * scale + shift

    # matmul #2 partial product for this (D tile, C tile), f32 accumulation.
    part = jnp.dot(hn_ref[...].astype(w2_ref.dtype), w2_ref[...],
                   preferred_element_type=jnp.float32)

    @pl.when(d == 0)
    def _():
        acc_ref[c] = jnp.broadcast_to(b2_ref[...], acc_ref.shape[1:])

    acc_ref[c] = acc_ref[c] + part

    @pl.when(d == n_d - 1)
    def _():
        out_ref[...] = acc_ref[c]


def make_inter_fc_forward(params, features_size, batch_size):
    """One-time parameter prep + kernel construction (hoisted off the hot path).

    Folds the batch-independent completer contribution into the first bias, pads
    all lane dims to multiples of 128, casts MXU operands to bf16, and plans
    VMEM-aware tiles.  Returns (prepared_arrays, jitted_forward); the forward
    takes x (B, F) f32 plus the prepared arrays and returns (B, C) f32.
    """
    Fdim = int(features_size)
    B = int(batch_size)
    D = params["w1"].shape[1]
    C = params["w2"].shape[1]

    Fp = _round_up(Fdim, LANE)

    cap = _vmem_capacity_bytes()
    budget = int(cap * 0.55)
    tile_d, tile_c, Dp, Cp, need = _plan_tiles(B, Fp, D, C, budget)
    n_d, n_c = Dp // tile_d, Cp // tile_c
    vmem_limit = int(min(cap * 0.8, max(2 * need, 32 << 20)))

    # ---- one-time parameter preprocessing (NOT in the per-call hot path) ----
    w1 = params["w1"].astype(jnp.float32)
    # Fold the batch-independent completer rows into the first bias (f32, exact
    # w.r.t. the original module up to the bf16 MXU operand rounding elsewhere).
    b1_eff = params["b1"].astype(jnp.float32) + \
        params["completer"].astype(jnp.float32) @ w1[Fdim:, :]
    w1_p = jnp.pad(w1[:Fdim, :], ((0, Fp - Fdim), (0, Dp - D))).astype(jnp.bfloat16)
    b1_p = jnp.pad(b1_eff, ((0, 0), (0, Dp - D)))
    gamma_p = jnp.pad(params["gamma"].astype(jnp.float32), ((0, 0), (0, Dp - D)))
    beta_p = jnp.pad(params["beta"].astype(jnp.float32), ((0, 0), (0, Dp - D)))
    w2_p = jnp.pad(params["w2"].astype(jnp.float32),
                   ((0, Dp - D), (0, Cp - C))).astype(jnp.bfloat16)
    b2_p = jnp.pad(params["b2"].astype(jnp.float32), ((0, 0), (0, Cp - C)))
    prepared = (w1_p, b1_p, gamma_p, beta_p, w2_p, b2_p)

    call = pl.pallas_call(
        _inter_fc_kernel,
        out_shape=jax.ShapeDtypeStruct((B, Cp), jnp.float32),
        grid_spec=pltpu.PrefetchScalarGridSpec(
            num_scalar_prefetch=0,
            grid=(n_d, n_c),
            in_specs=[
                pl.BlockSpec((B, Fp), lambda d, c: (0, 0)),          # x (bf16)
                pl.BlockSpec((Fp, tile_d), lambda d, c: (0, d)),     # w1 tile (bf16)
                pl.BlockSpec((1, tile_d), lambda d, c: (0, d)),      # folded bias
                pl.BlockSpec((1, tile_d), lambda d, c: (0, d)),      # gamma
                pl.BlockSpec((1, tile_d), lambda d, c: (0, d)),      # beta
                pl.BlockSpec((tile_d, tile_c), lambda d, c: (d, c)), # w2 tile (bf16)
                pl.BlockSpec((1, tile_c), lambda d, c: (0, c)),      # b2
            ],
            out_specs=pl.BlockSpec((B, tile_c), lambda d, c: (0, c)),
            scratch_shapes=[
                pltpu.VMEM((B, tile_d), jnp.float32),       # hn cache for this D tile
                pltpu.VMEM((n_c, B, tile_c), jnp.float32),  # persistent accumulator
            ],
        ),
        compiler_params=pltpu.CompilerParams(
            # d is a reduction; c reuses the hn cache written at c == 0, so both
            # axes must stay sequential.  At small batch the kernel is
            # weight-bandwidth bound, so megacore sharding (v7x) would mostly
            # contend for the same HBM stream anyway.
            dimension_semantics=("arbitrary", "arbitrary"),
            vmem_limit_bytes=vmem_limit,
        ),
    )

    def fwd(x, w1_p, b1_p, gamma_p, beta_p, w2_p, b2_p):
        # Per-call work touches only activations: cast to bf16 and zero-pad F to
        # a lane multiple (exact: the matching w1 rows are zero).
        x_p = jnp.pad(x.astype(jnp.bfloat16), ((0, 0), (0, Fp - Fdim)))
        out_p = call(x_p, w1_p, b1_p, gamma_p, beta_p, w2_p, b2_p)
        return out_p[:, :C]

    return prepared, jax.jit(fwd)


def make_params(key, features_size, class_number, hidden_multiplicator=2.0):
    """Parameter init mirroring the module's __init__ shapes (weights stored (in, out))."""
    D = int(features_size * hidden_multiplicator)
    ks = jax.random.split(key, 5)
    lim = 1.0 / jnp.sqrt(D)
    w1 = jax.random.uniform(ks[0], (D, D), jnp.float32, -lim, lim)
    b1 = jax.random.uniform(ks[1], (1, D), jnp.float32, -lim, lim)
    w2 = jax.random.uniform(ks[2], (D, class_number), jnp.float32, -lim, lim)
    b2 = jax.random.uniform(ks[3], (1, class_number), jnp.float32, -lim, lim)
    gamma = jnp.ones((1, D), jnp.float32)
    beta = jnp.zeros((1, D), jnp.float32)
    # The module initializes completer to zeros, but it is a learnable parameter;
    # use small nonzero values so the bias-fold path is actually exercised.
    completer = 0.1 * jax.random.normal(ks[4], (1, D - features_size), jnp.float32)
    return dict(completer=completer, w1=w1, b1=b1,
                gamma=gamma, beta=beta, w2=w2, b2=b2)


def reference(x, p):
    """Module-semantics reference (concat -> linear -> relu -> BN train -> linear),
    with the same bf16 MXU-operand / f32-accumulation numerics as the kernel."""
    B = x.shape[0]
    y = jnp.concatenate(
        [x, jnp.broadcast_to(p["completer"], (B, p["completer"].shape[1]))], axis=1)
    h = jnp.dot(y.astype(jnp.bfloat16), p["w1"].astype(jnp.bfloat16),
                preferred_element_type=jnp.float32) + p["b1"]
    h = jnp.maximum(h, 0.0)
    mean = h.mean(axis=0, keepdims=True)
    var = ((h - mean) ** 2).mean(axis=0, keepdims=True)
    hn = (h - mean) / jnp.sqrt(var + BN_EPS) * p["gamma"] + p["beta"]
    out = jnp.dot(hn.astype(jnp.bfloat16), p["w2"].astype(jnp.bfloat16),
                  preferred_element_type=jnp.float32) + p["b2"]
    return out


if __name__ == "__main__":
    features_size = 32
    class_number = 8
    hidden_multiplicator = 2.0
    batch = 8

    key = jax.random.PRNGKey(0)
    kx, kp = jax.random.split(key)
    x = jax.random.normal(kx, (batch, features_size), jnp.float32)
    params = make_params(kp, features_size, class_number, hidden_multiplicator)

    # One-time prep (completer fold, padding, bf16 cast, tile planning) ...
    prepared, fwd = make_inter_fc_forward(params, features_size, batch)
    # ... then the hot path touches only activations.
    out = jax.block_until_ready(fwd(x, *prepared))

    ref = reference(x, params)
    assert out.shape == (batch, class_number)
    err = float(jnp.max(jnp.abs(out - ref)))
    # bf16 MXU operands => ~2-3 significant decimal digits; 1e-2 is the right scale.
    assert jnp.allclose(out, ref, atol=1e-2, rtol=1e-2), err
    print("KERNEL_OK")
</pallas_src>

<mosaic_0001>
module attributes {stable_mosaic.version = 11 : i64} {
  func.func @_inter_fc_kernel(%arg0: i32, %arg1: i32, %arg2: memref<8x128xbf16, #tpu.memory_space<vmem>>, %arg3: memref<128x128xbf16, #tpu.memory_space<vmem>>, %arg4: memref<1x128xf32, #tpu.memory_space<vmem>>, %arg5: memref<1x128xf32, #tpu.memory_space<vmem>>, %arg6: memref<1x128xf32, #tpu.memory_space<vmem>>, %arg7: memref<128x128xbf16, #tpu.memory_space<vmem>>, %arg8: memref<1x128xf32, #tpu.memory_space<vmem>>, %arg9: memref<8x128xf32, #tpu.memory_space<vmem>>, %arg10: memref<8x128xf32, #tpu.memory_space<vmem>>, %arg11: memref<1x8x128xf32, #tpu.memory_space<vmem>>) attributes {dimension_semantics = [#tpu.dimension_semantics<arbitrary>, #tpu.dimension_semantics<arbitrary>], iteration_bounds = array<i64: 1, 1>, scalar_prefetch = 0 : i64, scratch_operands = 2 : i64, tpu.core_type = #tpu.core_type<tc>, window_params = [{pipeline_mode = #tpu.pipeline_mode<synchronous>, transform_indices = @transform_0, window_bounds = array<i64: 8, 128>}, {transform_indices = @transform_1, window_bounds = array<i64: 128, 128>}, {transform_indices = @transform_2, window_bounds = array<i64: 1, 128>}, {transform_indices = @transform_3, window_bounds = array<i64: 1, 128>}, {transform_indices = @transform_4, window_bounds = array<i64: 1, 128>}, {transform_indices = @transform_5, window_bounds = array<i64: 128, 128>}, {transform_indices = @transform_6, window_bounds = array<i64: 1, 128>}, {transform_indices = @transform_7, window_bounds = array<i64: 8, 128>}]} {
    %c0_i32 = arith.constant 0 : i32
    %0 = arith.cmpi eq, %arg1, %c0_i32 : i32
    %1 = arith.extui %0 : i1 to i32
    %c0_i32_0 = arith.constant 0 : i32
    %2 = arith.cmpi ne, %1, %c0_i32_0 : i32
    scf.if %2 {
      %c0_12 = arith.constant 0 : index
      %c0_13 = arith.constant 0 : index
      %21 = vector.load %arg2[%c0_12, %c0_13] : memref<8x128xbf16, #tpu.memory_space<vmem>>, vector<8x128xbf16>
      %c0_14 = arith.constant 0 : index
      %c0_15 = arith.constant 0 : index
      %22 = vector.load %arg3[%c0_14, %c0_15] : memref<128x128xbf16, #tpu.memory_space<vmem>>, vector<128x128xbf16>
      %cst_16 = arith.constant dense<0.000000e+00> : vector<8x128xf32>
      %23 = tpu.matmul %21, %22, %cst_16 {dimension_numbers = #tpu.dot_dimension_numbers<[1], [0], [0], [1], [0, 0, 1, 1], [], []>} : vector<8x128xbf16>, vector<128x128xbf16>, vector<8x128xf32> -> vector<8x128xf32>
      %c0_17 = arith.constant 0 : index
      %c0_18 = arith.constant 0 : index
      %24 = vector.load %arg4[%c0_17, %c0_18] : memref<1x128xf32, #tpu.memory_space<vmem>>, vector<1x128xf32>
      %25 = vector.broadcast %24 : vector<1x128xf32> to vector<8x128xf32>
      %26 = arith.addf %23, %25 : vector<8x128xf32>
      %cst_19 = arith.constant 0.000000e+00 : f32
      %27 = vector.broadcast %cst_19 : f32 to vector<8x128xf32>
      %28 = arith.maximumf %26, %27 : vector<8x128xf32>
      %cst_20 = arith.constant dense<0.000000e+00> : vector<128xf32>
      %29 = vector.multi_reduction <add>, %28, %cst_20 [0] : vector<8x128xf32> to vector<128xf32>
      %30 = vector.shape_cast %29 : vector<128xf32> to vector<1x128xf32>
      %31 = arith.mulf %28, %28 : vector<8x128xf32>
      %cst_21 = arith.constant dense<0.000000e+00> : vector<128xf32>
      %32 = vector.multi_reduction <add>, %31, %cst_21 [0] : vector<8x128xf32> to vector<128xf32>
      %33 = vector.shape_cast %32 : vector<128xf32> to vector<1x128xf32>
      %cst_22 = arith.constant 1.250000e-01 : f32
      %34 = vector.broadcast %cst_22 : f32 to vector<1x128xf32>
      %35 = arith.mulf %30, %34 : vector<1x128xf32>
      %cst_23 = arith.constant 1.250000e-01 : f32
      %36 = vector.broadcast %cst_23 : f32 to vector<1x128xf32>
      %37 = arith.mulf %33, %36 : vector<1x128xf32>
      %38 = arith.mulf %35, %35 : vector<1x128xf32>
      %39 = arith.subf %37, %38 : vector<1x128xf32>
      %cst_24 = arith.constant 0.000000e+00 : f32
      %40 = vector.broadcast %cst_24 : f32 to vector<1x128xf32>
      %41 = arith.maximumf %39, %40 : vector<1x128xf32>
      %c0_25 = arith.constant 0 : index
      %c0_26 = arith.constant 0 : index
      %42 = vector.load %arg5[%c0_25, %c0_26] : memref<1x128xf32, #tpu.memory_space<vmem>>, vector<1x128xf32>
      %cst_27 = arith.constant 9.99999974E-6 : f32
      %43 = vector.broadcast %cst_27 : f32 to vector<1x128xf32>
      %44 = arith.addf %41, %43 : vector<1x128xf32>
      %45 = math.rsqrt %44 : vector<1x128xf32>
      %46 = arith.mulf %42, %45 : vector<1x128xf32>
      %c0_28 = arith.constant 0 : index
      %c0_29 = arith.constant 0 : index
      %47 = vector.load %arg6[%c0_28, %c0_29] : memref<1x128xf32, #tpu.memory_space<vmem>>, vector<1x128xf32>
      %48 = arith.mulf %35, %46 : vector<1x128xf32>
      %49 = arith.subf %47, %48 : vector<1x128xf32>
      %50 = vector.broadcast %46 : vector<1x128xf32> to vector<8x128xf32>
      %51 = arith.mulf %28, %50 : vector<8x128xf32>
      %52 = vector.broadcast %49 : vector<1x128xf32> to vector<8x128xf32>
      %53 = arith.addf %51, %52 : vector<8x128xf32>
      %c0_30 = arith.constant 0 : index
      %c0_31 = arith.constant 0 : index
      %54 = vector.load %arg10[%c0_30, %c0_31] : memref<8x128xf32, #tpu.memory_space<vmem>>, vector<8x128xf32>
      tpu.vector_store %arg10[%c0_30, %c0_31], %53 {strides = array<i32>} : memref<8x128xf32, #tpu.memory_space<vmem>>, vector<8x128xf32>,
    } else {
    }
    %c0 = arith.constant 0 : index
    %c0_1 = arith.constant 0 : index
    %3 = vector.load %arg10[%c0, %c0_1] : memref<8x128xf32, #tpu.memory_space<vmem>>, vector<8x128xf32>
    %4 = arith.truncf %3 : vector<8x128xf32> to vector<8x128xbf16>
    %c0_2 = arith.constant 0 : index
    %c0_3 = arith.constant 0 : index
    %5 = vector.load %arg7[%c0_2, %c0_3] : memref<128x128xbf16, #tpu.memory_space<vmem>>, vector<128x128xbf16>
    %cst = arith.constant dense<0.000000e+00> : vector<8x128xf32>
    %6 = tpu.matmul %4, %5, %cst {dimension_numbers = #tpu.dot_dimension_numbers<[1], [0], [0], [1], [0, 0, 1, 1], [], []>} : vector<8x128xbf16>, vector<128x128xbf16>, vector<8x128xf32> -> vector<8x128xf32>
    %c0_i32_4 = arith.constant 0 : i32
    %7 = arith.cmpi eq, %arg0, %c0_i32_4 : i32
    %8 = arith.extui %7 : i1 to i32
    %c0_i32_5 = arith.constant 0 : i32
    %9 = arith.cmpi ne, %8, %c0_i32_5 : i32
    scf.if %9 {
      %c0_12 = arith.constant 0 : index
      %c0_13 = arith.constant 0 : index
      %21 = vector.load %arg8[%c0_12, %c0_13] : memref<1x128xf32, #tpu.memory_space<vmem>>, vector<1x128xf32>
      %22 = vector.shape_cast %21 : vector<1x128xf32> to vector<1x128xf32>
      %23 = vector.broadcast %22 : vector<1x128xf32> to vector<8x128xf32>
      %24 = arith.index_cast %arg1 : i32 to index
      %c0_14 = arith.constant 0 : index
      %c0_15 = arith.constant 0 : index
      %25 = vector.load %arg11[%24, %c0_14, %c0_15] : memref<1x8x128xf32, #tpu.memory_space<vmem>>, vector<1x8x128xf32>
      %26 = vector.shape_cast %25 : vector<1x8x128xf32> to vector<8x128xf32>
      %27 = vector.shape_cast %23 : vector<8x128xf32> to vector<1x8x128xf32>
      tpu.vector_store %arg11[%24, %c0_14, %c0_15], %27 {strides = array<i32>} : memref<1x8x128xf32, #tpu.memory_space<vmem>>, vector<1x8x128xf32>,
    } else {
    }
    %10 = arith.index_cast %arg1 : i32 to index
    %c0_6 = arith.constant 0 : index
    %c0_7 = arith.constant 0 : index
    %11 = vector.load %arg11[%10, %c0_6, %c0_7] : memref<1x8x128xf32, #tpu.memory_space<vmem>>, vector<1x8x128xf32>
    %12 = vector.shape_cast %11 : vector<1x8x128xf32> to vector<8x128xf32>
    %13 = arith.addf %12, %6 : vector<8x128xf32>
    %14 = arith.index_cast %arg1 : i32 to index
    %c0_8 = arith.constant 0 : index
    %c0_9 = arith.constant 0 : index
    %15 = vector.load %arg11[%14, %c0_8, %c0_9] : memref<1x8x128xf32, #tpu.memory_space<vmem>>, vector<1x8x128xf32>
    %16 = vector.shape_cast %15 : vector<1x8x128xf32> to vector<8x128xf32>
    %17 = vector.shape_cast %13 : vector<8x128xf32> to vector<1x8x128xf32>
    tpu.vector_store %arg11[%14, %c0_8, %c0_9], %17 {strides = array<i32>} : memref<1x8x128xf32, #tpu.memory_space<vmem>>, vector<1x8x128xf32>,
    %c0_i32_10 = arith.constant 0 : i32
    %18 = arith.cmpi eq, %arg0, %c0_i32_10 : i32
    %19 = arith.extui %18 : i1 to i32
    %c0_i32_11 = arith.constant 0 : i32
    %20 = arith.cmpi ne, %19, %c0_i32_11 : i32
    scf.if %20 {
      %21 = arith.index_cast %arg1 : i32 to index
      %c0_12 = arith.constant 0 : index
      %c0_13 = arith.constant 0 : index
      %22 = vector.load %arg11[%21, %c0_12, %c0_13] : memref<1x8x128xf32, #tpu.memory_space<vmem>>, vector<1x8x128xf32>
      %23 = vector.shape_cast %22 : vector<1x8x128xf32> to vector<8x128xf32>
      %c0_14 = arith.constant 0 : index
      %c0_15 = arith.constant 0 : index
      %24 = vector.load %arg9[%c0_14, %c0_15] : memref<8x128xf32, #tpu.memory_space<vmem>>, vector<8x128xf32>
      tpu.vector_store %arg9[%c0_14, %c0_15], %23 {strides = array<i32>} : memref<8x128xf32, #tpu.memory_space<vmem>>, vector<8x128xf32>,
    } else {
    }
    return
  }
  func.func @transform_0(%arg0: i32, %arg1: i32) -> (i32, i32) {
    %c0_i32 = arith.constant 0 : i32
    %c0_i32_0 = arith.constant 0 : i32
    %c0_i32_1 = arith.constant 0 : i32
    return %c0_i32, %c0_i32_0 : i32, i32
  }
  func.func @transform_1(%arg0: i32, %arg1: i32) -> (i32, i32) {
    %c0_i32 = arith.constant 0 : i32
    %c0_i32_0 = arith.constant 0 : i32
    return %c0_i32, %arg0 : i32, i32
  }
  func.func @transform_2(%arg0: i32, %arg1: i32) -> (i32, i32) {
    %c0_i32 = arith.constant 0 : i32
    %c0_i32_0 = arith.constant 0 : i32
    return %c0_i32, %arg0 : i32, i32
  }
  func.func @transform_3(%arg0: i32, %arg1: i32) -> (i32, i32) {
    %c0_i32 = arith.constant 0 : i32
    %c0_i32_0 = arith.constant 0 : i32
    return %c0_i32, %arg0 : i32, i32
  }
  func.func @transform_4(%arg0: i32, %arg1: i32) -> (i32, i32) {
    %c0_i32 = arith.constant 0 : i32
    %c0_i32_0 = arith.constant 0 : i32
    return %c0_i32, %arg0 : i32, i32
  }
  func.func @transform_5(%arg0: i32, %arg1: i32) -> (i32, i32) {
    %c0_i32 = arith.constant 0 : i32
    return %arg0, %arg1 : i32, i32
  }
  func.func @transform_6(%arg0: i32, %arg1: i32) -> (i32, i32) {
    %c0_i32 = arith.constant 0 : i32
    %c0_i32_0 = arith.constant 0 : i32
    return %c0_i32, %arg1 : i32, i32
  }
  func.func @transform_7(%arg0: i32, %arg1: i32) -> (i32, i32) {
    %c0_i32 = arith.constant 0 : i32
    %c0_i32_0 = arith.constant 0 : i32
    return %c0_i32, %arg1 : i32, i32
  }
}

</mosaic_0001>

<bundles_post_ra>
// kernel: fwd.1
= control target key start
LH: loop header
LB: loop body
LE: loop exit
PB: predicated region body
PF: predicated region fallthrough
CT: control target
= control target key end

     0   :  { %12 = vsyncpa [#allocation5], 0  ;;  %s543_s0 = inlined_call_operand.vmem [shape: bf16[8,128], index: 0, kind: input, shape index: {}]   ;;  %s544_s1 = inlined_call_operand.hbm [shape: bf16[128,128], index: 1, kind: input, shape index: {}]   ;;  %s545_s2 = inlined_call_operand.vmem [shape: f32[1,128], index: 2, kind: input, shape index: {}]   ;;  %s546_s3 = inlined_call_operand.vmem [shape: f32[1,128], index: 3, kind: input, shape index: {}]   ;;  %s547_s4 = inlined_call_operand.vmem [shape: f32[1,128], index: 4, kind: input, shape index: {}]   ;;  %s548_s5 = inlined_call_operand.hbm [shape: bf16[128,128], index: 5, kind: input, shape index: {}]   ;;  %s549_s6 = inlined_call_operand.vmem [shape: f32[1,128], index: 6, kind: input, shape index: {}]   ;;  %s550_s7 = inlined_call_operand.hbm [shape: f32[8,128], index: 7, kind: output, shape index: {}]  }
   0x1   :  { %13 = vsyncpa [#allocation8], 0 }
   0x2   :  { %14 = vsyncpa [#allocation6], 0  ;;  %s21_s26 = sshll.u32 %s544_s1, 4  ;;  %s474_s27 = smov [#allocation4]   ;;  %s22_s26 = int_to_ptr.hbm [resolvable:$true] %s21_s26 }
   0x3   :  { %s23_s28 = sshll.u32 %s474_s27, 4  ;;  %s40_s8 = sshll.u32 %s548_s5, 4  ;;  %s24_s28 = int_to_ptr.vmem [resolvable:$true] %s23_s28  ;;  %s41_s8 = int_to_ptr.hbm [resolvable:$true] %s40_s8 }
   0x4   :  { %s475_s9 = smov 64   ;;  %s476_s10 = smov 4  }
   0x5   :  { %29 = dma.hbm_to_vmem [thread:$0]  %s22_s26, 1024, %s24_s28, [#allocation5], %s475_s9, %s475_s9, %s476_s10  }
   0x6   :  { %s477_s11 = smov [#allocation7]  }
   0x7   :  { %s42_s12 = sshll.u32 %s477_s11, 4  ;;  %s43_s12 = int_to_ptr.vmem [resolvable:$true] %s42_s12 }
   0x8   :  { %48 = dma.hbm_to_vmem [thread:$0]  %s41_s8, 1024, %s43_s12, [#allocation8], %s475_s9, %s475_s9, %s476_s10  }
   0x9   :  { %468 = dma.done.wait [#allocation5], 1024  }
   0xa   :  { %469 = vsyncadd [#allocation5], 4294966272 }
   0xb   :  { %470 = dma.done.wait [#allocation8], 1024  }
   0xc   :  { %471 = vsyncadd [#allocation8], 4294966272  ;;  %v378_v0 = vld [vmem:[#allocation4 + $0x38] sm:$0xff]  ;;  %v377_v1 = vld [vmem:[#allocation4 + $0x30] sm:$0xff]  ;;  %s296_s22 = sshll.u32 %s550_s7, 4  ;;  %s297_s22 = int_to_ptr.hbm [resolvable:$true] %s296_s22 }
   0xd   :  { %132 = vmatpush.bf16.msra.mxu0 %v378_v0  ;;  %v376_v2 = vld [vmem:[#allocation4 + $0x28] sm:$0xff]  ;;  %v375_v3 = vld [vmem:[#allocation4 + $0x20] sm:$0xff]  ;;  %v374_v4 = vld [vmem:[#allocation4 + $0x18] sm:$0xff] }
   0xe   :  { %v373_v5 = vld [vmem:[#allocation4 + $0x10] sm:$0xff]  ;;  %v372_v6 = vld [vmem:[#allocation4 + $0x8] sm:$0xff]  ;;  %v371_v7 = vld [vmem:[#allocation4] sm:$0xff] }
   0xf   :  { %v63_v8 = vld [vmem:[%s543_s0] sm:$0xf]  ;;  %v386_v9 = vld [vmem:[#allocation7 + $0x38] sm:$0xff]  ;;  %v385_v10 = vld [vmem:[#allocation7 + $0x30] sm:$0xff] }
  0x10   :  { %255 = vmatpush.bf16.msra.mxu1 %v386_v9  ;;  %v384_v11 = vld [vmem:[#allocation7 + $0x28] sm:$0xff]  ;;  %v383_v12 = vld [vmem:[#allocation7 + $0x20] sm:$0xff]  ;;  %v382_v14 = vld [vmem:[#allocation7 + $0x18] sm:$0xff] }
  0x11   :  { %133 = vmatpush.bf16.msra.mxu0 %v377_v1  ;;  %v392_v13 = vld [vmem:[%s545_s2] ss:$0 sm:$0xff]  ;;  %v381_v17 = vld [vmem:[#allocation7 + $0x10] sm:$0xff]  ;;  %v380_v21 = vld [vmem:[#allocation7 + $0x8] sm:$0xff] }
  0x12   :  { %v379_v27 = vld [vmem:[#allocation7] sm:$0xff] }
  0x13   :  { %v164_v46 = vld [vmem:[%s546_s3] sm:$0x1]  ;;  %s478_s3 = smov [#allocation9]  }
  0x14   :  { %256 = vmatpush.bf16.msra.mxu1 %v385_v10  ;;  %v177_v50 = vld [vmem:[%s547_s4] sm:$0x1]  ;;  %s294_s19 = sshll.u32 %s478_s3, 4  ;;  %s295_s19 = int_to_ptr.vmem [resolvable:$true] %s294_s19 }
  0x15   :  { %134 = vmatpush.bf16.msra.mxu0 %v376_v2  ;;  %v393_v58 = vld [vmem:[%s549_s6] ss:$0 sm:$0xff] }
  0x18   :  { %257 = vmatpush.bf16.msra.mxu1 %v384_v11 }
  0x19   :  { %135 = vmatpush.bf16.msra.mxu0 %v375_v3 }
  0x1c   :  { %258 = vmatpush.bf16.msra.mxu1 %v383_v12 }
  0x1d   :  { %136 = vmatpush.bf16.msra.mxu0 %v374_v4 }
  0x20   :  { %259 = vmatpush.bf16.msra.mxu1 %v382_v14 }
  0x21   :  { %137 = vmatpush.bf16.msra.mxu0 %v373_v5 }
  0x24   :  { %260 = vmatpush.bf16.msra.mxu1 %v381_v17 }
  0x25   :  { %138 = vmatpush.bf16.msra.mxu0 %v372_v6 }
  0x28   :  { %261 = vmatpush.bf16.msra.mxu1 %v380_v21 }
  0x29   :  { %139 = vmatpush.bf16.msra.mxu0 %v371_v7 }
  0x2c   :  { %140 = vmatmul.bf16.vlgmr.msra.gmra.mxu0 %v63_v8  ;;  %262 = vmatpush.bf16.msra.mxu1 %v379_v27 }
  0xa9   :  { %v141_v15 = vpop.f32.mrf.mxu0 }
  0xaa   :  { %v142_v16 = vadd.f32 %v392_v13, %v141_v15 }
  0xac   :  { %v145_v18 = vmax.f32 %v142_v16, 0.0 }
  0xae   :  { %v146_v19 = vrot.slane %v145_v18, 4  ;;  %v152_v20 = vmul.f32 %v145_v18, %v145_v18 }
  0xb0   :  { %v147_v22 = vadd.f32 %v146_v19, %v145_v18  ;;  %v153_v23 = vrot.slane %v152_v20, 4 }
  0xb1   :  { %v143_v24 = vpop.f32.mrf.mxu0 }
  0xb2   :  { %v148_v25 = vrot.slane %v147_v22, 2  ;;  %v154_v26 = vadd.f32 %v153_v23, %v152_v20 }
  0xb4   :  { %v155_v28 = vrot.slane %v154_v26, 2  ;;  %v149_v29 = vadd.f32 %v148_v25, %v147_v22 }
  0xb6   :  { %v156_v30 = vadd.f32 %v155_v28, %v154_v26  ;;  %v150_v31 = vrot.slane %v149_v29, 1 }
  0xb8   :  { %v157_v32 = vrot.slane %v156_v30, 1  ;;  %v151_v33 = vadd.f32 %v150_v31, %v149_v29 }
  0xba   :  { %v158_v34 = vadd.f32 %v157_v32, %v156_v30  ;;  %v159_v35 = vmul.f32 0.125, %v151_v33 }
  0xbc   :  { %v160_v36 = vmul.f32 0.125, %v158_v34  ;;  %v161_v37 = vmul.f32 %v159_v35, %v159_v35 }
  0xbe   :  { %v162_v38 = vsub.f32 %v160_v36, %v161_v37 }
  0xc0   :  { %v163_v39 = vmax.f32 %v162_v38, 0.0 }
  0xc2   :  { %v165_v40 = vadd.f32 1e-05, %v163_v39 }
  0xc4   :  { %394 = vrsqrt.f32 %v165_v40  ;;  %vm172_vm1 = vweird.f32 %v165_v40 }
  0xca   :  { %v395_v41 = vpop.eup %394 }
  0xcb   :  { %v167_v42 = vmul.f32 %v395_v41, %v165_v40  ;;  %vm173_vm0 = vweird.f32 %v395_v41 }
  0xcc   :  { %vm174_vm2 = vmor %vm172_vm1, %vm173_vm0 }
  0xcd   :  { %v168_v43 = vmul.f32 %v395_v41, %v167_v42 }
  0xcf   :  { %v169_v44 = vmul.f32 0.5, %v168_v43 }
  0xd1   :  { %v170_v45 = vsub.f32 1.5, %v169_v44 }
  0xd3   :  { %v171_v47 = vmul.f32 %v395_v41, %v170_v45 }
  0xd5   :  { %v175_v48 = vsel %vm174_vm2, %v395_v41, %v171_v47 }
  0xd6   :  { %v176_v49 = vmul.f32 %v175_v48, %v164_v46 }
  0xd8   :  { %v178_v51 = vmul.f32 %v176_v49, %v159_v35  ;;  %v181_v52 = vperm.slane %v176_v49, 0 }
  0xda   :  { %v179_v53 = vsub.f32 %v177_v50, %v178_v51  ;;  %v183_v54 = vmul.f32 %v181_v52, %v145_v18 }
  0xdc   :  { %v185_v55 = vperm.slane %v179_v53, 0 }
  0xde   :  { %v187_v56 = vadd.f32 %v185_v55, %v183_v54 }
  0xe0   :  { %v190_v57 = vpack.c.bf16 %v187_v56, %v187_v56 }
  0xe2   :  { %263 = vmatmul.bf16.vlgmr.msra.gmra.mxu1 %v190_v57 }
 0x15f   :  { %v264_v59 = vpop.f32.mrf.mxu1 }
 0x160   :  { %v282_v60 = vadd.f32 %v393_v58, %v264_v59 }
 0x162   :  { %288 = vst [vmem:[#allocation9] sm:$0xff] %v282_v60 }
 0x163   :  { %299 = dma.vmem_to_hbm [thread:$0]  %s295_s19, 128, %s297_s22, [#allocation6]  }
 0x167   :  { %v266_v61 = vpop.f32.mrf.mxu1 }
 0x168   :  { %472 = dma.done.wait [#allocation6], 128  }
 0x169   :  { %473 = vsyncadd [#allocation6], 4294967168 }
 0x16a   :  { %304 = vsyncpa [#allocation5], 1 }
 0x16b   :  { %305 = vsyncpa [#allocation8], 1 }
 0x16c   :  { %306 = vsyncpa [#allocation6], 1 }

</bundles_post_ra>
